<compile_context>
chip_gen: v6e
topology: v6e:2x2x1
jax: 0.10.0
libtpu: 0.0.40
codegen_flags: <defaults>
</compile_context>

<pallas_src>
import functools

import jax
import jax.numpy as jnp
import numpy as np
from jax import lax
from jax.experimental import pallas as pl
from jax.experimental.pallas import tpu as pltpu


def _rfft_trunc_kernel(x_ref, f_ref, o_ref, *, bb):
    # x_ref: (BB, N, ck)   BB batches of the (B, N, c*k) input
    # f_ref: (N, Fpad)     fused [cos | -sin | 0-pad] truncated-DFT matrix
    # o_ref: (BB, ck, Fpad) fused [Re | Im | 0-pad] output
    f = f_ref[...]                                  # hoisted: loaded once, reused BB times
    tn_dims = (((0,), (0,)), ((), ()))              # contract over N (transposed-LHS matmul)
    for b in range(bb):                             # static unroll
        o_ref[b] = lax.dot_general(
            x_ref[b], f, tn_dims,
            precision=lax.Precision.HIGHEST,        # Mosaic supports DEFAULT/HIGHEST only
            preferred_element_type=jnp.float32)


@functools.lru_cache(maxsize=None)
def _fused_dft_matrix_np(N, l, fpad):
    """(N, fpad) float32: cols [0,l)=cos, [l,2l)=-sin, rest zero. Built in float64 with
    exact integer (n*m) mod N argument reduction; cached per (N, l)."""
    n = np.arange(N, dtype=np.int64)[:, None]
    m = np.arange(l, dtype=np.int64)[None, :]
    ang = (2.0 * np.pi / N) * ((n * m) % N).astype(np.float64)
    f = np.zeros((N, fpad), dtype=np.float32)
    f[:, :l] = np.cos(ang).astype(np.float32)
    f[:, l:2 * l] = (-np.sin(ang)).astype(np.float32)
    return f


def _pick_bb(B, N, ck, fpad):
    """Batches per grid step: fat steps amortize the ~0.35us/step overhead, but keep
    >= 2 grid steps when B >= 2 (v7x dual-TC megacore) and bound per-step VMEM."""
    per_b_bytes = 2 * (N * ck + ck * fpad) * 4      # x + out blocks, double-buffered, f32
    budget = 8 * 1024 * 1024
    bb = max(1, budget // max(per_b_bytes, 1))
    bb = int(min(bb, max(1, B // 2)))               # keep >= 2 parallel steps when possible
    while B % bb:
        bb -= 1
    return max(bb, 1)


def sparse_kernel_ft1d_pre_forward(x, modes1):
    """x: (B, N, c, k) float32.  Returns (out_ft complex64 of shape (B, c*k, N//2+1), N)."""
    B, N, c, k = x.shape
    ck = c * k
    M = N // 2 + 1
    l = min(modes1, M)
    fpad = ((2 * l + 127) // 128) * 128             # lane-dense output width

    # (B, N, c, k) -> (B, N, c*k): contiguous reshape, no data movement.
    x2 = x.reshape(B, N, ck).astype(jnp.float32)
    f = jnp.asarray(_fused_dft_matrix_np(N, l, fpad))

    BB = _pick_bb(B, N, ck, fpad)
    grid = (B // BB,)

    # VMEM sizing from the actual per-step footprint (double buffers), capped for v7x.
    vmem_est = 2 * (BB * N * ck + N * fpad + BB * ck * fpad) * 4 + (1 << 20)
    vmem_limit = int(min(max(vmem_est, 4 << 20), 48 << 20))

    out = pl.pallas_call(
        functools.partial(_rfft_trunc_kernel, bb=BB),
        out_shape=jax.ShapeDtypeStruct((B, ck, fpad), jnp.float32),
        grid=grid,
        in_specs=[
            pl.BlockSpec((BB, N, ck), lambda b: (b, 0, 0)),
            pl.BlockSpec((N, fpad), lambda b: (0, 0)),
        ],
        out_specs=pl.BlockSpec((BB, ck, fpad), lambda b: (b, 0, 0)),
        compiler_params=pltpu.CompilerParams(
            dimension_semantics=("parallel",),
            vmem_limit_bytes=vmem_limit,
        ),
    )(x2, f)

    # Split the fused output, zero-pad the dropped modes to M, and assemble complex64.
    # TODO(synk): complex packing (lax.complex) cannot be expressed inside the Pallas kernel.
    re = jnp.pad(out[:, :, :l], ((0, 0), (0, 0), (0, M - l)))
    im = jnp.pad(out[:, :, l:2 * l], ((0, 0), (0, 0), (0, M - l)))
    out_ft = lax.complex(re, im)
    return out_ft, N


def _reference(x, modes1):
    """Pure-JAX reference matching the PyTorch module."""
    B, N, c, k = x.shape
    x2 = x.reshape(B, N, c * k).transpose(0, 2, 1)          # (B, c*k, N)
    xf = jnp.fft.rfft(x2, axis=-1)                          # (B, c*k, N//2+1)
    M = N // 2 + 1
    l = min(modes1, M)
    mask = jnp.arange(M) < l
    out_ft = jnp.where(mask[None, None, :], xf, 0.0 + 0.0j)
    return out_ft.astype(jnp.complex64), N


if __name__ == "__main__":
    # x: (B, N, c, k) with c*k = 32, N//2+1 = 9, l = min(alpha, 9) = 5 kept modes.
    B, N, c, k = 2, 16, 4, 8
    alpha = 5

    key = jax.random.PRNGKey(0)
    x = jax.random.normal(key, (B, N, c, k), dtype=jnp.float32)

    out_ft, n_ret = sparse_kernel_ft1d_pre_forward(x, alpha)
    out_ft = jax.block_until_ready(out_ft)

    ref_ft, n_ref = _reference(x, alpha)
    assert n_ret == n_ref == N
    np.testing.assert_allclose(np.asarray(out_ft), np.asarray(ref_ft),
                               rtol=1e-4, atol=1e-4)

    print("KERNEL_OK")
</pallas_src>

<mosaic_0001>
module attributes {stable_mosaic.version = 11 : i64} {
  func.func @_rfft_trunc_kernel(%arg0: i32, %arg1: memref<1x16x32xf32, #tpu.memory_space<vmem>>, %arg2: memref<16x128xf32, #tpu.memory_space<vmem>>, %arg3: memref<1x32x128xf32, #tpu.memory_space<vmem>>) attributes {dimension_semantics = [#tpu.dimension_semantics<parallel>], iteration_bounds = array<i64: 2>, scalar_prefetch = 0 : i64, scratch_operands = 0 : i64, tpu.core_type = #tpu.core_type<tc>, window_params = [{transform_indices = @transform_0, window_bounds = array<i64: 1, 16, 32>}, {pipeline_mode = #tpu.pipeline_mode<synchronous>, transform_indices = @transform_1, window_bounds = array<i64: 16, 128>}, {transform_indices = @transform_2, window_bounds = array<i64: 1, 32, 128>}]} {
    %c0 = arith.constant 0 : index
    %c0_0 = arith.constant 0 : index
    %0 = vector.load %arg2[%c0, %c0_0] : memref<16x128xf32, #tpu.memory_space<vmem>>, vector<16x128xf32>
    %c0_1 = arith.constant 0 : index
    %c0_2 = arith.constant 0 : index
    %c0_3 = arith.constant 0 : index
    %1 = vector.load %arg1[%c0_1, %c0_2, %c0_3] : memref<1x16x32xf32, #tpu.memory_space<vmem>>, vector<1x16x32xf32>
    %2 = vector.shape_cast %1 : vector<1x16x32xf32> to vector<16x32xf32>
    %cst = arith.constant dense<0.000000e+00> : vector<32x128xf32>
    %3 = tpu.matmul %2, %0, %cst {dimension_numbers = #tpu.dot_dimension_numbers<[0], [0], [1], [1], [0, 1, 1, 1], [], []>, precision = #tpu.contract_precision<fp32>} : vector<16x32xf32>, vector<16x128xf32>, vector<32x128xf32> -> vector<32x128xf32>
    %c0_4 = arith.constant 0 : index
    %c0_5 = arith.constant 0 : index
    %c0_6 = arith.constant 0 : index
    %4 = vector.load %arg3[%c0_4, %c0_5, %c0_6] : memref<1x32x128xf32, #tpu.memory_space<vmem>>, vector<1x32x128xf32>
    %5 = vector.shape_cast %4 : vector<1x32x128xf32> to vector<32x128xf32>
    %6 = vector.shape_cast %3 : vector<32x128xf32> to vector<1x32x128xf32>
    tpu.vector_store %arg3[%c0_4, %c0_5, %c0_6], %6 {strides = array<i32>} : memref<1x32x128xf32, #tpu.memory_space<vmem>>, vector<1x32x128xf32>,
    return
  }
  func.func @transform_0(%arg0: i32) -> (i32, i32, i32) {
    %c0_i32 = arith.constant 0 : i32
    %c0_i32_0 = arith.constant 0 : i32
    %c0_i32_1 = arith.constant 0 : i32
    return %arg0, %c0_i32, %c0_i32_0 : i32, i32, i32
  }
  func.func @transform_1(%arg0: i32) -> (i32, i32) {
    %c0_i32 = arith.constant 0 : i32
    %c0_i32_0 = arith.constant 0 : i32
    %c0_i32_1 = arith.constant 0 : i32
    return %c0_i32, %c0_i32_0 : i32, i32
  }
  func.func @transform_2(%arg0: i32) -> (i32, i32, i32) {
    %c0_i32 = arith.constant 0 : i32
    %c0_i32_0 = arith.constant 0 : i32
    %c0_i32_1 = arith.constant 0 : i32
    return %arg0, %c0_i32, %c0_i32_0 : i32, i32, i32
  }
}

</mosaic_0001>

<bundles_post_ra>
// kernel: tpu_custom_call.1
= control target key start
LH: loop header
LB: loop body
LE: loop exit
PB: predicated region body
PF: predicated region fallthrough
CT: control target
= control target key end

     0   :  { %7 = vsyncpa [#allocation3], 0  ;;  %s1453_s0 = inlined_call_operand.hbm [shape: f32[2,16,32], index: 0, kind: input, shape index: {}]   ;;  %s1454_s1 = inlined_call_operand.hbm [shape: f32[16,128], index: 1, kind: input, shape index: {}]   ;;  %s1455_s2 = inlined_call_operand.hbm [shape: f32[2,32,128], index: 2, kind: output, shape index: {}]  }
   0x1   :  { %9 = vsyncpa [#allocation3 + $0x1], 0 }
   0x2   :  { %10 = vsyncpa [#allocation6], 0 }
   0x3   :  { %11 = vsyncpa [#allocation4], 0 }
   0x4   :  { %13 = vsyncpa [#allocation4 + $0x1], 0  ;;  %s1237_s9 = smov 0   ;;  %s1239_s10 = smov 0  }
   0x5   :  { %s1241_s11 = smov 0   ;;  %s1243_s12 = smov 0  }
   0x6 LB: > { %s1258_s13 = sadd.s32 4294967295, %s1213_s12   ;;  %s915_s14 = sadd.s32 4294967294, %s1213_s12   ;;  %s1213_s12 = sphi %s1243_s12, %s1477_s12   ;;  %s1209_s11 = sphi %s1241_s11, %s1476_s11   ;;  %s1205_s10 = sphi %s1239_s10, %s1475_s10   ;;  %s1201_s9 = sphi %s1237_s9, %s1474_s9  }
   0x7   : > { %p39_p0 = scmp.ne.s32.totalorder %s1205_s10, %s1201_s9  ;;  %p1456_p1 = scmp.eq.s32.totalorder %s1258_s13, 0 }
   0x8   : > { %p90_p3 = scmp.eq.s32.totalorder %s915_s14, 1  ;;  %p916_p5 = scmp.ge.s32.totalorder %s1213_s12, 1 }
   0x9   : > { %p1267_p4 = por %p1456_p1, %p39_p0  ;;  %p97_p7 = scmp.lt.s32.totalorder %s1213_s12, 3 }
   0xa   : > { %p1272_p6 = por %p90_p3, %p39_p0  ;;  %s1215_s18 = smov [#allocation5]  }
   0xb   : > { %s1460_s15 = scalar_select %p1267_p4, 1, 0 }
   0xc   : > { %s1461_s16 = scalar_select %p1272_p6, 1, 0 }
   0xd   : > { %p1277_p8 = pnand %p916_p5, %p97_p7  ;;  %s109_s19 = sshll.u32 %s1215_s18, 4  ;;  %s110_s19 = int_to_ptr.vmem [resolvable:$true] %s109_s19 }
   0xe   : > { %s1291_s21 = sadd.s32 1, %s1213_s12   ;;  %s26_s22 = sadd.s32 1, %s1209_s11 }
   0xf   : > { %s1462_s17 = scalar_select %p1277_p8, 1, 0 }
  0x10   : > { %p1037_p9 = pneg %p1277_p8  ;;  %s23_s23 = ssub.s32 %s1213_s12, %s1291_s21 }
  0x11   : > { %s1102_s24 = scalar_lea.vmem %s110_s19, 256  ;;  %p1110_p5 = scmp.lt.s32.totalorder %s110_s19, %s110_s19 }
  0x12   : > { %p1286_p11 = pnand %p1037_p9, %p1456_p1  ;;  %p1103_p13 = scmp.ne.s32.totalorder %s110_s19, %s1102_s24 }
  0x13   : > { %p1111_p7 = scmp.lt.s32.totalorder %s1102_s24, %s1102_s24 }
  0x14   : > { %p1093_p12 = pneg %p1286_p11 }
  0x15   : > { %p1112_p10 = por %p1111_p7, %p1110_p5 }
  0x16   : > { %p1105_p0 = pnand %p1103_p13, %p1093_p12 }
  0x18   : > { %p1106_p3 = pneg %p1105_p0 }
  0x1a   : > { %p1113_p2 = pnand %p1112_p10, %p1106_p3 }
  0x1c   : > { %1116 = shalt.err (!%p1113_p2)
}
  0x1d   : > { %s1216_s25 = smov 128   ;;  %s1217_s26 = smov 8  }
  0x1e   : > { %1040 = dma.hbm_to_vmem [thread:$0]  (!%p1286_p11), %s1454_s1, 256, %s110_s19, [#allocation6], %s1216_s25, %s1216_s25, %s1217_s26  }
  0x1f   : > { %p24_p2 = scmp.eq.s32.totalorder %s23_s23, 0  ;;  %p33_p9 = scmp.ne.s32.totalorder %s1209_s11, %s1205_s10 }
  0x20   : > { %p34_p10 = scmp.eq.s32.totalorder %s1213_s12, 0  ;;  %p1050_p12 = scmp.lt.s32.totalorder %s1213_s12, 2 }
  0x21   : > { %s1311_s29 = scalar_select %p24_p2, %s1209_s11, %s26_s22  }
  0x22   : > { %p35_p13 = por %p34_p10, %p33_p9  ;;  %p1464_p0 = scmp.eq.s32.totalorder %s1258_s13, 1 }
  0x23   : > { %s123_s3 = sand.u32 1, %s1209_s11   ;;  %s931_s4 = sshll.u32 %s1213_s12, 8 }
  0x24   : > { %p1315_p3 = por %p1464_p0, %p33_p9  ;;  %s919_s5 = sshll.u32 %s123_s3, 4 }
  0x25   : > { %s1324_s8 = scalar_lea.hbm %s1453_s0, %s931_s4  ;;  %s127_s14 = scalar_lea.vmem [#allocation2], %s919_s5 }
  0x26   : > { %s1465_s30 = scalar_select %p1315_p3, 1, 0 }
  0x27   : > { %s134_s18 = sshll.u32 %s127_s14, 4  ;;  %p1326_p11 = pnand %p1050_p12, %p35_p13  ;;  %s1330_s18 = int_to_ptr.vmem [resolvable:$true] %s134_s18 }
  0x28   : > { %s1332_s20 = scalar_lea.sflag [#allocation3], %s123_s3  ;;  %s1117_s22 = scalar_lea.hbm %s1324_s8, 256 }
  0x29   : > { %p1118_p5 = scmp.ne.s32.totalorder %s1324_s8, %s1117_s22  ;;  %p1119_p7 = pneg %p1326_p11 }
  0x2a   : > { %s1122_s27 = scalar_lea.hbm %s1453_s0, 512  ;;  %p1123_p10 = scmp.lt.s32.totalorder %s1324_s8, %s1453_s0 }
  0x2b   : > { %p1120_p2 = pnand %p1119_p7, %p1118_p5  ;;  %p1124_p12 = scmp.lt.s32.totalorder %s1122_s27, %s1117_s22 }
  0x2d   : > { %p1121_p9 = pneg %p1120_p2  ;;  %p1125_p13 = por %p1124_p12, %p1123_p10 }
  0x2f   : > { %p1126_p0 = pnand %p1125_p13, %p1121_p9 }
  0x31   : > { %1129 = shalt.err (!%p1126_p0)
}
  0x32   : > { %s1130_s3 = scalar_lea.vmem %s1330_s18, 256  ;;  %s1218_s5 = smov [#allocation2]  }
  0x33   : > { %p1131_p1 = scmp.ne.s32.totalorder %s1330_s18, %s1130_s3  ;;  %s1135_s6 = sshll.u32 %s1218_s5, 4  ;;  %s1136_s6 = int_to_ptr.vmem [resolvable:$false] %s1135_s6 }
  0x34   : > { %s1137_s7 = scalar_lea.vmem %s1136_s6, 512  ;;  %p1138_p2 = scmp.lt.s32.totalorder %s1330_s18, %s1136_s6 }
  0x35   : > { %p1133_p6 = pnand %p1131_p1, %p1119_p7  ;;  %p1139_p3 = scmp.lt.s32.totalorder %s1137_s7, %s1130_s3 }
  0x37   : > { %p1134_p5 = pneg %p1133_p6  ;;  %p1140_p4 = por %p1139_p3, %p1138_p2 }
  0x39   : > { %p1141_p8 = pnand %p1140_p4, %p1134_p5 }
  0x3b   : > { %1144 = shalt.err (!%p1141_p8)
}
  0x3c   : > { %1044 = dma.hbm_to_vmem [thread:$0]  (!%p1326_p11), %s1324_s8, 256, %s1330_s18, %s1332_s20, %s1216_s25, %s1216_s25, %s1217_s26  }
  0x3d   : > { %p1467_p1 = scmp.ne.s32.totalorder %s1462_s17, 0 }
  0x3e   : > { %s1359_s14 = sand.u32 (!%p1467_p1), 1, %s1205_s10   ;;  %p1468_p4 = scmp.ne.s32.totalorder (!%p1467_p1), %s1460_s15, 0 }
  0x3f   : > { %146 = sbr.rel (%p1467_p1) target bundleno = 450 (0x1c2), region = 28  ;;  %s923_s22 = sshll.u32 (!%p1467_p1), %s1359_s14, 4 }
  0x40   : > { %s149_s23 = scalar_lea.sflag (!%p1467_p1), [#allocation3], %s1359_s14  ;;  %s152_s24 = scalar_lea.vmem (!%p1467_p1), [#allocation2], %s923_s22 }
  0x44   : > { %1188 = dma.done.wait (%p1468_p4), %s149_s23, 256  }
  0x45   : > { %1190 = vsyncadd (%p1468_p4), %s149_s23, 4294967040  ;;  %p1469_p6 = scmp.eq.s32.totalorder %s1258_s13, 0 }
  0x47   : > { %1192 = dma.done.wait (%p1469_p6), [#allocation6], 256   ;;  %p1470_p8 = pmov %p1469_p6 }
  0x48   : > { %v179_v0 = vld [vmem:[%s152_s24] sm:$0xff]  ;;  %v178_v1 = vld [vmem:[#allocation5 + $0x8] sm:$0xff]  ;;  %vm213_vm0 = vcmask 130048   ;;  %s925_s15 = sshll.u32 %s1359_s14, 5  ;;  %s932_s26 = sshll.u32 %s1258_s13, 9 }
  0x49   : > { %1194 = vsyncadd (%p1470_p8), [#allocation6], 4294967040  ;;  %181 = vxpose.xlu0.b32.start [1/2] (short) (narrow) %v179_v0, 32  ;;  %v1371_v2 = vand.u32 4294901760, %v178_v1  ;;  %v177_v3 = vld [vmem:[#allocation5] sm:$0xff]  ;;  %v180_v4 = vld [vmem:[%s152_s24 + $0x8] sm:$0xff]  ;;  %s1410_s19 = scalar_lea.hbm %s1455_s2, %s932_s26 }
  0x4a   : > { %v1373_v5 = vand.u32 4294901760, %v177_v3  ;;  %s176_s17 = scalar_lea.vmem [#allocation7], %s925_s15  ;;  %s819_s20 = scalar_lea.sflag [#allocation4], %s1359_s14 }
  0x4b   : > { %v363_v6 = vsub.f32 %v178_v1, %v1371_v2  ;;  %969 = vmatprep.subr.mxu0 %v1371_v2  ;;  %s832_s25 = sshll.u32 %s176_s17, 4  ;;  %p1471_p11 = scmp.ne.s32.totalorder %s1465_s30, 0  ;;  %s1405_s25 = int_to_ptr.vmem [resolvable:$true] %s832_s25 }
  0x4c   : > { %v370_v7 = vsub.f32 %v177_v3, %v1373_v5  ;;  %970 = vmatpush3.msra.mxu0 %v1371_v2  ;;  %s1145_s13 = scalar_lea.vmem %s1405_s25, 512  ;;  %s1219_s27 = smov [#allocation7]  }
  0x4d   : > { %182 = vxpose.xlu0.b32.end [2/2] (short) (narrow) %v180_v4, 32  ;;  %v1379_v8 = vand.u32 4294901760, %v363_v6  ;;  %971 = vmatprep.subr.mxu0 %v1373_v5  ;;  %p1146_p3 = scmp.ne.s32.totalorder %s1405_s25, %s1145_s13  ;;  %s1149_s28 = sshll.u32 %s1219_s27, 4  ;;  %s1150_s28 = int_to_ptr.vmem [resolvable:$false] %s1149_s28 }
  0x4e   : > { %v1382_v9 = vand.u32 4294901760, %v370_v7  ;;  %972 = vmatpush3.msra.mxu0 %v1373_v5  ;;  %s1151_s4 = scalar_lea.vmem %s1150_s28, 1024  ;;  %p1152_p10 = scmp.lt.s32.totalorder %s1405_s25, %s1150_s28 }
  0x4f   : > { %v365_v10 = vsub.f32 %v363_v6, %v1379_v8  ;;  %989 = vmatprep.subr.mxu0 %v363_v6  ;;  %p1147_p7 = pnand %p1146_p3, %p1471_p11  ;;  %p1153_p12 = scmp.lt.s32.totalorder %s1151_s4, %s1145_s13 }
  0x50   : > { %v372_v11 = vsub.f32 %v370_v7, %v1382_v9 }
  0x51   : > { %v366_v12 = vand.u32 4294901760, %v365_v10  ;;  %p1148_p9 = pneg %p1147_p7  ;;  %p1154_p13 = por %p1153_p12, %p1152_p10 }
  0x52   : > { %v373_v13 = vand.u32 4294901760, %v372_v11 }
  0x53   : > { %979 = vmatprep.subr.mxu1 %v366_v12  ;;  %p1155_p0 = pnand %p1154_p13, %p1148_p9 }
  0x54   : > { %980 = vmatpush3.msra.mxu1 %v366_v12 }
  0x55   : > { %981 = vmatprep.subr.mxu1 %v373_v13 }
  0x56   : > { %982 = vmatpush3.msra.mxu1 %v373_v13 }
  0x57   : > { %999 = vmatprep.subr.mxu1 %v1371_v2 }
  0xc5   : > { %v197_v14 = vpop.trf.xlu0 }
  0xc6   : > { %v215_v15 = vsel %vm213_vm0, %v197_v14, 0 }
  0xc7   : > { %v293_v16 = vand.u32 4294901760, %v215_v15 }
  0xc9   : > { %v294_v17 = vsub.f32 %v215_v15, %v293_v16  ;;  %983 = vmatprep.mubr.f32.mxu1 %v293_v16  ;;  %v198_v18 = vpop.trf.xlu0 }
  0xca   : > { %v218_v19 = vsel %vm213_vm0, %v198_v18, 0 }
  0xcb   : > { %v303_v20 = vand.u32 4294901760, %v218_v19  ;;  %v295_v21 = vand.u32 4294901760, %v294_v17 }
  0xcd   : > { %v304_v22 = vsub.f32 %v218_v19, %v303_v20  ;;  %v199_v23 = vpop.trf.xlu0  ;;  %984 = vmatmul.mubr.f32.vlgmr.msra.gmra.mxu1 %v303_v20  ;;  %v296_v24 = vsub.f32 %v294_v17, %v295_v21 }
  0xce   : > { %v221_v25 = vsel %vm213_vm0, %v199_v23, 0  ;;  %1000 = vmatpush3.msra.mxu1 %v1371_v2 }
  0xcf   : > { %v305_v26 = vand.u32 4294901760, %v304_v22  ;;  %v313_v27 = vand.u32 4294901760, %v221_v25  ;;  %v297_v28 = vand.u32 4294901760, %v296_v24  ;;  %1001 = vmatprep.subr.mxu1 %v1373_v5 }
  0xd0   : > { %1002 = vmatpush3.msra.mxu1 %v1373_v5 }
  0xd1   : > { %v314_v29 = vsub.f32 %v221_v25, %v313_v27  ;;  %973 = vmatprep.mubr.f32.mxu0 %v297_v28  ;;  %v200_v30 = vpop.trf.xlu0  ;;  %986 = vmatprep.mubr.f32.mxu1 %v313_v27  ;;  %v306_v31 = vsub.f32 %v304_v22, %v305_v26 }
  0xd2   : > { %v224_v32 = vsel %vm213_vm0, %v200_v30, 0  ;;  %1019 = vmatprep.subr.mxu1 %v1371_v2 }
  0xd3   : > { %v315_v33 = vand.u32 4294901760, %v314_v29  ;;  %v323_v34 = vand.u32 4294901760, %v224_v32  ;;  %v307_v35 = vand.u32 4294901760, %v306_v31 }
  0xd5   : > { %v324_v36 = vsub.f32 %v224_v32, %v323_v34  ;;  %974 = vmatmul.mubr.f32.vlgmr.msra.gmra.mxu0 %v307_v35  ;;  %987 = vmatmul.mubr.f32.gmra.mxu1 %v323_v34  ;;  %v316_v37 = vsub.f32 %v314_v29, %v315_v33 }
  0xd6   : > { %1003 = vmatprep.mubr.f32.mxu1 %v295_v21  ;;  %990 = vmatpush3.msra.mxu0 %v363_v6 }
  0xd7   : > { %v325_v38 = vand.u32 4294901760, %v324_v36  ;;  %v317_v39 = vand.u32 4294901760, %v316_v37  ;;  %991 = vmatprep.subr.mxu0 %v370_v7 }
  0xd8   : > { %992 = vmatpush3.msra.mxu0 %v370_v7 }
  0xd9   : > { %976 = vmatprep.mubr.f32.mxu0 %v317_v39  ;;  %1004 = vmatmul.mubr.f32.vlgmr.msra.gmra.mxu1 %v305_v26  ;;  %v326_v40 = vsub.f32 %v324_v36, %v325_v38 }
  0xda   : > { %1006 = vmatprep.mubr.f32.mxu1 %v315_v33  ;;  %1020 = vmatpush3.msra.mxu1 %v1371_v2 }
  0xdb   : > { %v327_v41 = vand.u32 4294901760, %v326_v40  ;;  %1021 = vmatprep.subr.mxu1 %v1373_v5  ;;  %1009 = vmatprep.subr.mxu0 %v1379_v8 }
  0xdc   : > { %1022 = vmatpush3.msra.mxu1 %v1373_v5 }
  0xdd   : > { %977 = vmatmul.mubr.f32.gmra.mxu0 %v327_v41  ;;  %1007 = vmatmul.mubr.f32.gmra.mxu1 %v325_v38 }
  0xde   : > { %993 = vmatprep.mubr.f32.mxu0 %v294_v17  ;;  %1023 = vmatprep.mubr.f32.mxu1 %v293_v16 }
  0xe1   : > { %994 = vmatmul.mubr.f32.vlgmr.msra.gmra.mxu0 %v304_v22  ;;  %1024 = vmatmul.mubr.f32.vlgmr.msra.gmra.mxu1 %v303_v20 }
  0xe2   : > { %1010 = vmatpush3.msra.mxu0 %v1379_v8  ;;  %996 = vmatprep.mubr.f32.mxu0 %v314_v29 }
  0xe3   : > { %1026 = vmatprep.mubr.f32.mxu1 %v313_v27  ;;  %1011 = vmatprep.subr.mxu0 %v1382_v9 }
  0xe4   : > { %1012 = vmatpush3.msra.mxu0 %v1382_v9 }
  0xe5   : > { %997 = vmatmul.mubr.f32.gmra.mxu0 %v324_v36  ;;  %1027 = vmatmul.mubr.f32.gmra.mxu1 %v323_v34 }
  0xe6   : > { %1013 = vmatprep.mubr.f32.mxu0 %v293_v16 }
  0xe9   : > { %1014 = vmatmul.mubr.f32.vlgmr.msra.gmra.mxu0 %v303_v20 }
  0xea   : > { %1016 = vmatprep.mubr.f32.mxu0 %v313_v27 }
  0xed   : > { %1017 = vmatmul.mubr.f32.gmra.mxu0 %v323_v34 }
 0x18d   : > { %v985_v42 = vpop.f32.mrf.mxu1 }
 0x18f   : > { %v410_v43 = vpop.f32.mrf.mxu1 }
 0x195   : > { %v988_v44 = vpop.f32.mrf.mxu1  ;;  %v975_v45 = vpop.f32.mrf.mxu0 }
 0x196   : > { %v417_v55 = vadd.f32 %v985_v42, %v975_v45 }
 0x197   : > { %v422_v46 = vpop.f32.mrf.mxu1  ;;  %v299_v48 = vpop.f32.mrf.mxu0 }
 0x198   : > { %v411_v57 = vadd.f32 %v410_v43, %v299_v48 }
 0x199   : > { %v1005_v47 = vpop.f32.mrf.mxu1 }
 0x19b   : > { %v600_v49 = vpop.f32.mrf.mxu1 }
 0x19d   : > { %v978_v50 = vpop.f32.mrf.mxu0  ;;  %v1008_v51 = vpop.f32.mrf.mxu1 }
 0x19e   : > { %v429_v61 = vadd.f32 %v988_v44, %v978_v50 }
 0x19f   : > { %v319_v52 = vpop.f32.mrf.mxu0  ;;  %v616_v53 = vpop.f32.mrf.mxu1 }
 0x1a0   : > { %v423_v0 = vadd.f32 %v422_v46, %v319_v52 }
 0x1a1   : > { %v995_v54 = vpop.f32.mrf.mxu0  ;;  %v1025_v59 = vpop.f32.mrf.mxu1 }
 0x1a2   : > { %v512_v58 = vadd.f32 %v995_v54, %v417_v55 }
 0x1a3   : > { %v504_v56 = vpop.f32.mrf.mxu0  ;;  %v792_v3 = vpop.f32.mrf.mxu1 }
 0x1a4   : > { %v505_v62 = vadd.f32 %v504_v56, %v411_v57  ;;  %v609_v2 = vadd.f32 %v1005_v47, %v512_v58 }
 0x1a5   : > { %v998_v60 = vpop.f32.mrf.mxu0  ;;  %v1028_v12 = vpop.f32.mrf.mxu1 }
 0x1a6   : > { %v526_v1 = vadd.f32 %v998_v60, %v429_v61  ;;  %v601_v7 = vadd.f32 %v600_v49, %v505_v62 }
 0x1a7   : > { %v518_v63 = vpop.f32.mrf.mxu0  ;;  %v804_v20 = vpop.f32.mrf.mxu1 }
 0x1a8   : > { %v519_v5 = vadd.f32 %v518_v63, %v423_v0  ;;  %v625_v11 = vadd.f32 %v1008_v51, %v526_v1 }
 0x1a9   : > { %v1015_v4 = vpop.f32.mrf.mxu0 }
 0x1aa   : > { %v708_v6 = vadd.f32 %v1015_v4, %v609_v2  ;;  %v617_v16 = vadd.f32 %v616_v53, %v519_v5 }
 0x1ab   : > { %v701_v8 = vpop.f32.mrf.mxu0 }
 0x1ac   : > { %v799_v9 = vadd.f32 %v1025_v59, %v708_v6  ;;  %v702_v10 = vadd.f32 %v701_v8, %v601_v7 }
 0x1ad   : > { %v1018_v13 = vpop.f32.mrf.mxu0 }
 0x1ae   : > { %815 = vst [vmem:[%s176_s17 + $0x8] sm:$0xff] %v799_v9  ;;  %v793_v14 = vadd.f32 %v792_v3, %v702_v10  ;;  %v720_v15 = vadd.f32 %v1018_v13, %v625_v11 }
 0x1af   : > { %v713_v17 = vpop.f32.mrf.mxu0 }
 0x1b0   : > { %814 = vst [vmem:[%s176_s17] sm:$0xff] %v793_v14  ;;  %v811_v18 = vadd.f32 %v1028_v12, %v720_v15  ;;  %v714_v19 = vadd.f32 %v713_v17, %v617_v16 }
 0x1b2   : > { %817 = vst [vmem:[%s176_s17 + $0x18] sm:$0xff] %v811_v18  ;;  %v805_v21 = vadd.f32 %v804_v20, %v714_v19 }
 0x1b4   : > { %816 = vst [vmem:[%s176_s17 + $0x10] sm:$0xff] %v805_v21 }
 0x1b5   : > { %1158 = shalt.err (!%p1155_p0)
}
 0x1b6   : > { %s1159_s3 = scalar_lea.hbm %s1410_s19, 512  ;;  %s1163_s7 = scalar_lea.hbm %s1455_s2, 1024 }
 0x1b7   : > { %p1160_p5 = scmp.ne.s32.totalorder %s1410_s19, %s1159_s3  ;;  %p1164_p4 = scmp.lt.s32.totalorder %s1410_s19, %s1455_s2 }
 0x1b8   : > { %p1165_p6 = scmp.lt.s32.totalorder %s1163_s7, %s1159_s3 }
 0x1b9   : > { %p1161_p2 = pnand %p1160_p5, %p1471_p11 }
 0x1ba   : > { %p1166_p8 = por %p1165_p6, %p1164_p4 }
 0x1bb   : > { %p1162_p1 = pneg %p1161_p2 }
 0x1bd   : > { %p1167_p3 = pnand %p1166_p8, %p1162_p1 }
 0x1bf   : > { %1170 = shalt.err (!%p1167_p3)
}
 0x1c0   : > { %s1220_s24 = smov 128   ;;  %s1221_s15 = smov 8  }
 0x1c1   : > { %1035 = dma.vmem_to_hbm [thread:$0]  (%p1471_p11), %s1405_s25, 512, %s1410_s19, %s819_s20, %s1220_s24, %s1220_s24, %s1221_s15  }
 0x1c2 PF: > { %s847_s17 = sand.u32 1, %s1201_s9   ;;  %p1472_p7 = scmp.ne.s32.totalorder %s1461_s16, 0 }
 0x1c3   : > { %p1473_p9 = scmp.ge.s32.totalorder %s1213_s12, 2  ;;  %s848_s26 = scalar_lea.sflag [#allocation4], %s847_s17 }
 0x1c5   : > { %p1046_p10 = pnand %p1473_p9, %p1472_p7 }
 0x1c7   : > { %p1047_p12 = pneg %p1046_p10 }
 0x1c9   : > { %1196 = dma.done.wait (%p1047_p12), %s848_s26, 512  }
 0x1ca   : > { %1198 = vsyncadd (%p1047_p12), %s848_s26, 4294966784  ;;  %p16_p13 = scmp.ge.s32.totalorder %s1291_s21, 4   ;;  %s1474_s9 = smov %s1205_s10 }
 0x1cb   : > { %s1475_s10 = smov %s1209_s11  ;;  %s1476_s11 = smov %s1311_s29 }
 0x1cc   : > { %s1477_s12 = smov %s1291_s21  ;;  %18 = sbr.rel (!%p16_p13) target bundleno = 6 (0x6), region = 77 }
 0x1d1   :  { %853 = vsyncpa [#allocation3], 1 }
 0x1d2   :  { %855 = vsyncpa [#allocation3 + $0x1], 1 }
 0x1d3   :  { %856 = vsyncpa [#allocation6], 1 }
 0x1d4   :  { %857 = vsyncpa [#allocation4], 1 }
 0x1d5   :  { %859 = vsyncpa [#allocation4 + $0x1], 1 }

</bundles_post_ra>
